<compile_context>
chip_gen: v5e
topology: v5e:2x2
jax: 0.10.0
libtpu: 0.0.40
codegen_flags: <defaults>
</compile_context>

<pallas_src>
import functools

import jax
import jax.numpy as jnp
from jax.experimental import pallas as pl
from jax.experimental.pallas import tpu as pltpu


# ---------------------------------------------------------------------------
# Kernel A: fused QKV projection over row tiles of the flattened (B*N, F) input.
# ---------------------------------------------------------------------------
def _qkv_proj_kernel(x_ref, w_ref, b_ref, o_ref):
    # x_ref: (TR, F) bf16, w_ref: (F, 3F) bf16, b_ref: (1, 3F) f32, o_ref: (TR, 3F) bf16
    acc = jnp.dot(x_ref[...], w_ref[...], preferred_element_type=jnp.float32)
    o_ref[...] = (acc + b_ref[...]).astype(o_ref.dtype)


# ---------------------------------------------------------------------------
# Kernel B: multi-head attention (all heads batched) + fused output projection.
# One batch element per grid step.
# ---------------------------------------------------------------------------
def _attn_out_kernel(q_ref, k_ref, v_ref, wo_ref, bo_ref, o_ref, *, inv_scale):
    # q/k/v_ref: (1, H, N, hd) bf16   wo_ref: (H, hd, F) bf16   bo_ref: (1, F) f32
    # o_ref:     (1, N, F) f32
    q = q_ref[0] * inv_scale                      # fold 1/d into q once (stays bf16)
    k = k_ref[0]
    v = v_ref[0]

    # Scores for all heads in one batched contraction (contracts hd directly; no k.T).
    s = jnp.einsum("hqd,hkd->hqk", q, k,
                   preferred_element_type=jnp.float32)          # (H, N, N) f32

    # Numerically-stable softmax in f32; divide moved to the EUP via reciprocal.
    m = jnp.max(s, axis=-1, keepdims=True)
    e = jnp.exp(s - m)
    denom = jnp.sum(e, axis=-1, keepdims=True)
    p = e * pl.reciprocal(denom, approx=True)                   # (H, N, N) f32

    # Context for all heads in one batched contraction.
    ctx = jnp.einsum("hqk,hkd->hqd", p.astype(v.dtype), v,
                     preferred_element_type=jnp.float32)        # (H, N, hd) f32

    # Output projection fused in: concat-of-heads @ wo == sum_h ctx_h @ wo[h*hd:(h+1)*hd].
    out_h = jnp.einsum("hnd,hdf->hnf", ctx.astype(wo_ref.dtype), wo_ref[...],
                       preferred_element_type=jnp.float32)      # (H, N, F) f32
    out = jnp.sum(out_h, axis=0) + bo_ref[0]                    # (N, F) lane-dense store

    # dropout(p=0.0) -> identity
    o_ref[0] = out.astype(o_ref.dtype)


# ---------------------------------------------------------------------------
# Wrapper
# ---------------------------------------------------------------------------
def mhsa_pallas(x, params, head):
    """x: (B, N, F) float32. params: dict of pre-transposed (F_in, F_out) weights."""
    B, N, F = x.shape
    assert F % head == 0
    hd = F // head
    inv_scale = 19.5 / F                      # module uses d = feats / 19.5

    # One-time parameter layout prep (outside the kernels).
    wqkv = jnp.concatenate([params["wq"], params["wk"], params["wv"]],
                           axis=1).astype(jnp.bfloat16)          # (F, 3F)
    bqkv = jnp.concatenate([params["bq"], params["bk"], params["bv"]],
                           axis=1).astype(jnp.float32)           # (1, 3F)
    wo_r = params["wo"].reshape(head, hd, F).astype(jnp.bfloat16)
    bo = params["bo"].astype(jnp.float32)                        # (1, F)

    # ---- Kernel A: fused QKV projection, row-tiled over flattened (B*N). ----
    R = B * N
    x2d = x.reshape(R, F).astype(jnp.bfloat16)
    if R % 512 == 0:
        TR = 512            # big tiles when they fit (v6e has the VMEM headroom)
    elif R % 256 == 0:
        TR = 256            # matches 256-wide MXU on v6e/v7x
    elif R % 128 == 0:
        TR = 128            # v5e-friendly
    else:
        TR = R              # tiny/toy shapes: one full block

    qkv2d = pl.pallas_call(
        _qkv_proj_kernel,
        out_shape=jax.ShapeDtypeStruct((R, 3 * F), jnp.bfloat16),
        grid_spec=pltpu.PrefetchScalarGridSpec(
            num_scalar_prefetch=0,
            grid=(R // TR,),
            in_specs=[
                pl.BlockSpec((TR, F), lambda i: (i, 0)),      # x rows
                pl.BlockSpec((F, 3 * F), lambda i: (0, 0)),   # fused QKV weight (resident)
                pl.BlockSpec((1, 3 * F), lambda i: (0, 0)),   # fused QKV bias
            ],
            out_specs=pl.BlockSpec((TR, 3 * F), lambda i: (i, 0)),
        ),
        compiler_params=pltpu.CompilerParams(
            dimension_semantics=("parallel",),
            vmem_limit_bytes=64 * 1024 * 1024),
    )(x2d, wqkv, bqkv)

    # ---- Wrapper-side layout plumbing (cheap XLA ops): split heads. ----
    qkv = qkv2d.reshape(B, N, 3, head, hd)
    q = qkv[:, :, 0].transpose(0, 2, 1, 3)    # (B, head, N, hd) bf16
    k = qkv[:, :, 1].transpose(0, 2, 1, 3)
    v = qkv[:, :, 2].transpose(0, 2, 1, 3)

    # ---- Kernel B: batched-head attention + fused output projection. ----
    out = pl.pallas_call(
        functools.partial(_attn_out_kernel, inv_scale=inv_scale),
        out_shape=jax.ShapeDtypeStruct((B, N, F), jnp.float32),
        grid_spec=pltpu.PrefetchScalarGridSpec(
            num_scalar_prefetch=0,
            grid=(B,),
            in_specs=[
                pl.BlockSpec((1, head, N, hd), lambda b: (b, 0, 0, 0)),  # q
                pl.BlockSpec((1, head, N, hd), lambda b: (b, 0, 0, 0)),  # k
                pl.BlockSpec((1, head, N, hd), lambda b: (b, 0, 0, 0)),  # v
                pl.BlockSpec((head, hd, F), lambda b: (0, 0, 0)),        # wo (resident)
                pl.BlockSpec((1, F), lambda b: (0, 0)),                  # bo
            ],
            out_specs=pl.BlockSpec((1, N, F), lambda b: (b, 0, 0)),
        ),
        compiler_params=pltpu.CompilerParams(
            dimension_semantics=("parallel",),
            vmem_limit_bytes=64 * 1024 * 1024),
    )(q, k, v, wo_r, bo)

    return out


# ---------------------------------------------------------------------------
# Pure-JAX reference mirroring the PyTorch forward exactly (f32).
# ---------------------------------------------------------------------------
def mhsa_reference(x, params, head):
    B, N, F = x.shape
    hd = F // head
    d = F / 19.5
    q = (x @ params["wq"] + params["bq"]).reshape(B, N, head, hd).transpose(0, 2, 1, 3)
    k = (x @ params["wk"] + params["bk"]).reshape(B, N, head, hd).transpose(0, 2, 1, 3)
    v = (x @ params["wv"] + params["bv"]).reshape(B, N, head, hd).transpose(0, 2, 1, 3)
    score = jax.nn.softmax(jnp.einsum("bhif,bhjf->bhij", q, k) / d, axis=-1)
    attn = jnp.einsum("bhij,bhjf->bihf", score, v).reshape(B, N, F)
    return attn @ params["wo"] + params["bo"]


def init_params(key, feats):
    """Deterministic synthetic parameters. Weights stored as (F_in, F_out)."""
    keys = jax.random.split(key, 8)
    def w(k):
        return jax.random.normal(k, (feats, feats), jnp.float32) * 0.05
    def b(k):
        return jax.random.normal(k, (1, feats), jnp.float32) * 0.01
    return {
        "wq": w(keys[0]), "bq": b(keys[1]),
        "wk": w(keys[2]), "bk": b(keys[3]),
        "wv": w(keys[4]), "bv": b(keys[5]),
        "wo": w(keys[6]), "bo": b(keys[7]),
    }


if __name__ == "__main__":
    B, N, F, HEAD = 2, 8, 32, 8   # batch, seq, feats, heads (head_dim = 4)

    key = jax.random.PRNGKey(0)
    kx, kp = jax.random.split(key)
    x = jax.random.normal(kx, (B, N, F), jnp.float32)
    params = init_params(kp, F)

    out = mhsa_pallas(x, params, HEAD)
    out = jax.block_until_ready(out)

    ref = mhsa_reference(x, params, HEAD)
    assert out.shape == (B, N, F)
    # bf16 MXU inputs (f32 accumulation / f32 softmax) -> loosened tolerance vs f32 ref.
    assert jnp.allclose(out, ref, atol=2e-2, rtol=2e-2), "mismatch vs reference"

    print("KERNEL_OK")
</pallas_src>

<mosaic_0001>
module attributes {stable_mosaic.version = 11 : i64} {
  func.func @_qkv_proj_kernel(%arg0: i32, %arg1: memref<16x32xbf16, #tpu.memory_space<vmem>>, %arg2: memref<32x96xbf16, #tpu.memory_space<vmem>>, %arg3: memref<1x96xf32, #tpu.memory_space<vmem>>, %arg4: memref<16x96xbf16, #tpu.memory_space<vmem>>) attributes {dimension_semantics = [#tpu.dimension_semantics<parallel>], iteration_bounds = array<i64: 1>, scalar_prefetch = 0 : i64, scratch_operands = 0 : i64, tpu.core_type = #tpu.core_type<tc>, window_params = [{transform_indices = @transform_0, window_bounds = array<i64: 16, 32>}, {pipeline_mode = #tpu.pipeline_mode<synchronous>, transform_indices = @transform_1, window_bounds = array<i64: 32, 96>}, {pipeline_mode = #tpu.pipeline_mode<synchronous>, transform_indices = @transform_2, window_bounds = array<i64: 1, 96>}, {transform_indices = @transform_3, window_bounds = array<i64: 16, 96>}]} {
    %c0 = arith.constant 0 : index
    %c0_0 = arith.constant 0 : index
    %0 = vector.load %arg1[%c0, %c0_0] : memref<16x32xbf16, #tpu.memory_space<vmem>>, vector<16x32xbf16>
    %c0_1 = arith.constant 0 : index
    %c0_2 = arith.constant 0 : index
    %1 = vector.load %arg2[%c0_1, %c0_2] : memref<32x96xbf16, #tpu.memory_space<vmem>>, vector<32x96xbf16>
    %cst = arith.constant dense<0.000000e+00> : vector<16x96xf32>
    %2 = tpu.matmul %0, %1, %cst {dimension_numbers = #tpu.dot_dimension_numbers<[1], [0], [0], [1], [0, 0, 1, 1], [], []>} : vector<16x32xbf16>, vector<32x96xbf16>, vector<16x96xf32> -> vector<16x96xf32>
    %c0_3 = arith.constant 0 : index
    %c0_4 = arith.constant 0 : index
    %3 = vector.load %arg3[%c0_3, %c0_4] : memref<1x96xf32, #tpu.memory_space<vmem>>, vector<1x96xf32>
    %4 = vector.broadcast %3 : vector<1x96xf32> to vector<16x96xf32>
    %5 = arith.addf %2, %4 : vector<16x96xf32>
    %6 = arith.truncf %5 : vector<16x96xf32> to vector<16x96xbf16>
    %c0_5 = arith.constant 0 : index
    %c0_6 = arith.constant 0 : index
    %7 = vector.load %arg4[%c0_5, %c0_6] : memref<16x96xbf16, #tpu.memory_space<vmem>>, vector<16x96xbf16>
    tpu.vector_store %arg4[%c0_5, %c0_6], %6 {strides = array<i32>} : memref<16x96xbf16, #tpu.memory_space<vmem>>, vector<16x96xbf16>,
    return
  }
  func.func @transform_0(%arg0: i32) -> (i32, i32) {
    %c0_i32 = arith.constant 0 : i32
    %c0_i32_0 = arith.constant 0 : i32
    return %arg0, %c0_i32 : i32, i32
  }
  func.func @transform_1(%arg0: i32) -> (i32, i32) {
    %c0_i32 = arith.constant 0 : i32
    %c0_i32_0 = arith.constant 0 : i32
    %c0_i32_1 = arith.constant 0 : i32
    return %c0_i32, %c0_i32_0 : i32, i32
  }
  func.func @transform_2(%arg0: i32) -> (i32, i32) {
    %c0_i32 = arith.constant 0 : i32
    %c0_i32_0 = arith.constant 0 : i32
    %c0_i32_1 = arith.constant 0 : i32
    return %c0_i32, %c0_i32_0 : i32, i32
  }
  func.func @transform_3(%arg0: i32) -> (i32, i32) {
    %c0_i32 = arith.constant 0 : i32
    %c0_i32_0 = arith.constant 0 : i32
    return %arg0, %c0_i32 : i32, i32
  }
}

</mosaic_0001>

<bundles_post_ra>
// kernel: tpu_custom_call.1
= control target key start
LH: loop header
LB: loop body
LE: loop exit
PB: predicated region body
PF: predicated region fallthrough
CT: control target
= control target key end

     0   :  { %8 = vsyncpa [#allocation3], 0  ;;  %s264_s0 = inlined_call_operand.hbm [shape: bf16[16,32], index: 0, kind: input, shape index: {}]   ;;  %s265_s1 = inlined_call_operand.hbm [shape: bf16[32,96], index: 1, kind: input, shape index: {}]   ;;  %s266_s2 = inlined_call_operand.vmem [shape: f32[1,96], index: 2, kind: input, shape index: {}]   ;;  %s267_s3 = inlined_call_operand.hbm [shape: bf16[16,96], index: 3, kind: output, shape index: {}]  }
   0x1   :  { %9 = vsyncpa [#allocation6], 0 }
   0x2   :  { %10 = vsyncpa [#allocation4], 0  ;;  %s15_s14 = sshll.u32 %s264_s0, 4  ;;  %s218_s15 = smov [#allocation2]   ;;  %s16_s14 = int_to_ptr.hbm [resolvable:$true] %s15_s14 }
   0x3   :  { %s17_s16 = sshll.u32 %s218_s15, 4  ;;  %s28_s19 = sshll.u32 %s265_s1, 4  ;;  %s18_s16 = int_to_ptr.vmem [resolvable:$true] %s17_s16  ;;  %s29_s19 = int_to_ptr.hbm [resolvable:$true] %s28_s19 }
   0x4   :  { %s219_s20 = smov 64   ;;  %s220_s21 = smov 4  }
   0x5   :  { %23 = dma.hbm_to_vmem [thread:$0]  %s16_s14, 128, %s18_s16, [#allocation3], %s219_s20, %s219_s20, %s220_s21  }
   0x6   :  { %s221_s22 = smov [#allocation5]  }
   0x7   :  { %s30_s23 = sshll.u32 %s221_s22, 4  ;;  %s31_s23 = int_to_ptr.vmem [resolvable:$true] %s30_s23 }
   0x8   :  { %36 = dma.hbm_to_vmem [thread:$0]  %s29_s19, 256, %s31_s23, [#allocation6], %s219_s20, %s219_s20, %s220_s21  }
   0x9   :  { %212 = dma.done.wait [#allocation3], 128  }
   0xa   :  { %213 = vsyncadd [#allocation3], 4294967168 }
   0xb   :  { %214 = dma.done.wait [#allocation6], 256  }
   0xc   :  { %215 = vsyncadd [#allocation6], 4294967040  ;;  %v133_v0 = vld [vmem:[#allocation5 + $0x8] sm:$0xff]  ;;  %v132_v1 = vld [vmem:[#allocation5] sm:$0xff]  ;;  %vm75_vm0 = vcmask 261120   ;;  %vm95_vm1 = vcmask 781312  }
   0xd   :  { %85 = vmatpush.bf16.msra.mxu0 %v133_v0  ;;  %v131_v2 = vld [vmem:[#allocation2] sm:$0xff]  ;;  %s222_s24 = smov [#allocation7]   ;;  %s104_s28 = sshll.u32 %s267_s3, 4  ;;  %s105_s28 = int_to_ptr.hbm [resolvable:$true] %s104_s28 }
   0xe   :  { %v139_v3 = vld [vmem:[%s266_s2] ss:$0 sm:$0xff]  ;;  %s102_s25 = sshll.u32 %s222_s24, 4  ;;  %s103_s25 = int_to_ptr.vmem [resolvable:$true] %s102_s25 }
  0x11   :  { %86 = vmatpush.bf16.msra.mxu0 %v132_v1 }
  0x14   :  { %130 = vmatmul.msk.bf16.vlgmr.msra.gmra.mxu0 %vm75_vm0, %v131_v2 }
  0x91   :  { %v88_v4 = vpop.f32.mrf.mxu0 }
  0x92   :  { %v89_v5 = vadd.f32 %v139_v3, %v88_v4 }
  0x94   :  { %v93_v6 = vpack.c.bf16 %v89_v5, %v89_v5 }
  0x96   :  { %96 = vst.msk [vmem:[#allocation7] sm:$0xf] %vm95_vm1, %v93_v6 }
  0x99   :  { %v90_v7 = vpop.f32.mrf.mxu0 }
  0x9a   :  { %v91_v8 = vadd.f32 %v139_v3, %v90_v7 }
  0x9c   :  { %v94_v9 = vpack.c.bf16 %v91_v8, %v91_v8 }
  0x9e   :  { %97 = vst.msk [vmem:[#allocation7 + $0x4] sm:$0xf] %vm95_vm1, %v94_v9 }
  0x9f   :  { %110 = dma.vmem_to_hbm [thread:$0]  %s103_s25, 128, %s105_s28, [#allocation4], %s219_s20, %s219_s20, %s220_s21  }
  0xa0   :  { %216 = dma.done.wait [#allocation4], 128  }
  0xa1   :  { %217 = vsyncadd [#allocation4], 4294967168 }
  0xa2   :  { %115 = vsyncpa [#allocation3], 1 }
  0xa3   :  { %116 = vsyncpa [#allocation6], 1 }
  0xa4   :  { %117 = vsyncpa [#allocation4], 1 }

</bundles_post_ra>
